<compile_context>
chip_gen: v7x
topology: tpu7x:2x2x1
jax: 0.10.0
libtpu: 0.0.40
codegen_flags: <defaults>
</compile_context>

<pallas_src>
import jax
import jax.numpy as jnp
from jax.experimental import pallas as pl
from jax.experimental.pallas import tpu as pltpu


_LANES = 512           # lane-dense width (multiple of 128)
_MAX_TILE_ROWS = 512   # rows per grid step -> 512x512 f32 = 1 MiB per input
_PAD_LOGIT = -1.0e4    # neutral logit pad: its BCE contribution is exactly 0.0


def _round_up(x, m):
    return ((x + m - 1) // m) * m


# ----------------------------------------------------------------------------
# Kernel factory: fused (optional) pos-weighted BCE-with-logits + masked SE
# ----------------------------------------------------------------------------
def _make_kernel(pos_weight, do_bce, do_vel, tile_r, lanes):
    pw = float(pos_weight)
    n_groups = tile_r // 8

    def kernel(*refs):
        idx = 0
        logits_ref = None
        vpred_ref = vtgt_ref = None
        if do_bce:
            logits_ref = refs[idx]; idx += 1
        onsets_ref = refs[idx]; idx += 1
        if do_vel:
            vpred_ref = refs[idx]; idx += 1
            vtgt_ref = refs[idx]; idx += 1
        out_ref = refs[idx]; idx += 1
        accs = refs[idx:]                       # per-quantity (8, lanes) f32 accumulators

        i = pl.program_id(1)                    # inner (reduction) axis

        @pl.when(i == 0)
        def _init():
            for a in accs:
                a[...] = jnp.zeros_like(a)

        t = onsets_ref[...].astype(jnp.float32)

        parts = []
        if do_bce:
            x = logits_ref[...].astype(jnp.float32)
            # stable softplus(-x) = max(-x, 0) + log1p(exp(-|x|))   (EUP ops)
            sp_neg = jnp.maximum(-x, 0.0) + jnp.log1p(jnp.exp(-jnp.abs(x)))
            # BCEWithLogits(pos_weight) = pw*t*softplus(-x) + (1-t)*softplus(x)
            # with softplus(x) = softplus(-x) + x  ==>
            bce = sp_neg * (1.0 + (pw - 1.0) * t) + (1.0 - t) * x
            parts.append(bce)
        if do_vel:
            mask = t > 0.5
            diff = vpred_ref[...].astype(jnp.float32) - vtgt_ref[...].astype(jnp.float32)
            parts.append(jnp.where(mask, diff * diff, 0.0))   # masked squared error
            parts.append(jnp.where(mask, 1.0, 0.0))           # mask count

        # Per-lane partial accumulation: the reshape only regroups vregs;
        # the axis-0 sum is pure cross-vreg VPU adds (no XLU here).
        for a, p in zip(accs, parts):
            a[...] += jnp.sum(p.reshape(n_groups, 8, lanes), axis=0)

        @pl.when(i == pl.num_programs(1) - 1)
        def _finalize():
            # One lane-dense (n_out, lanes) store; the tiny cross-lane finish
            # happens in the JAX wrapper.
            out_ref[...] = jnp.concatenate(
                [jnp.sum(a[...], axis=0, keepdims=True) for a in accs], axis=0)

    return kernel


# ----------------------------------------------------------------------------
# Wrapper: lane-dense flatten + pad, tiled pallas_call, final tiny reduce
# ----------------------------------------------------------------------------
def _flatten_pad(arr, rows_padded, lanes, pad_value):
    flat = jnp.asarray(arr).reshape(-1)
    total = rows_padded * lanes
    n = flat.shape[0]
    if total != n:
        flat = jnp.pad(flat, (0, total - n), constant_values=pad_value)
    return flat.reshape(rows_padded, lanes)


def _run_fused(onset_logits, onsets, vel_pred, vel_tgt, pos_weight,
               do_bce, do_vel, tile_rows=_MAX_TILE_ROWS):
    n_elems = 1
    for s in jnp.shape(onsets):
        n_elems *= int(s)

    lanes = _LANES
    rows = max(pl.cdiv(n_elems, lanes), 1)
    rows = _round_up(rows, 8)
    tile_r = min(int(tile_rows), rows)
    tile_r = _round_up(tile_r, 8)
    n_blocks = pl.cdiv(rows, tile_r)
    n_par = 2 if n_blocks >= 2 else 1          # leading parallel axis (v7x dual-TC)
    n_blocks = _round_up(n_blocks, n_par)
    n_inner = n_blocks // n_par
    rows_padded = n_blocks * tile_r

    def row_block(p, i):
        return (p * n_inner + i, 0)

    inputs = []
    in_specs = []
    if do_bce:
        inputs.append(_flatten_pad(onset_logits, rows_padded, lanes, _PAD_LOGIT))
        in_specs.append(pl.BlockSpec((tile_r, lanes), row_block))
    inputs.append(_flatten_pad(onsets, rows_padded, lanes, 0.0))
    in_specs.append(pl.BlockSpec((tile_r, lanes), row_block))
    if do_vel:
        inputs.append(_flatten_pad(vel_pred, rows_padded, lanes, 0.0))
        in_specs.append(pl.BlockSpec((tile_r, lanes), row_block))
        inputs.append(_flatten_pad(vel_tgt, rows_padded, lanes, 0.0))
        in_specs.append(pl.BlockSpec((tile_r, lanes), row_block))

    n_out = (1 if do_bce else 0) + (2 if do_vel else 0)
    kernel = _make_kernel(pos_weight, do_bce, do_vel, tile_r, lanes)

    out = pl.pallas_call(
        kernel,
        out_shape=jax.ShapeDtypeStruct((n_par, n_out, lanes), jnp.float32),
        grid_spec=pltpu.PrefetchScalarGridSpec(
            num_scalar_prefetch=0,
            grid=(n_par, n_inner),
            in_specs=in_specs,
            out_specs=pl.BlockSpec((None, n_out, lanes), lambda p, i: (p, 0, 0)),
            scratch_shapes=[pltpu.VMEM((8, lanes), jnp.float32)] * n_out,
        ),
        compiler_params=pltpu.CompilerParams(
            dimension_semantics=("parallel", "arbitrary")),
    )(*inputs)

    sums = jnp.sum(out, axis=(0, 2))           # (n_out,) tiny cross-lane finish in JAX
    result = {"n_elems": float(n_elems)}
    k = 0
    if do_bce:
        result["bce_sum"] = sums[k]; k += 1
    if do_vel:
        result["vsq_sum"] = sums[k]
        result["vcnt"] = sums[k + 1]
    return result


# ----------------------------------------------------------------------------
# Module-level helpers mirroring onset_loss / velocity_loss (specialized kernels)
# ----------------------------------------------------------------------------
def onset_loss(predictions, targets, pos_weight=None):
    pw = 1.0 if pos_weight is None else float(pos_weight)
    r = _run_fused(predictions, targets, None, None, pw, do_bce=True, do_vel=False)
    return r["bce_sum"] / r["n_elems"]


def velocity_loss(predictions, targets, onset_mask):
    mask_f = jnp.asarray(onset_mask).astype(jnp.float32)
    r = _run_fused(None, mask_f, predictions, targets, 1.0, do_bce=False, do_vel=True)
    return jnp.where(r["vcnt"] > 0, r["vsq_sum"] / jnp.maximum(r["vcnt"], 1.0), 0.0)


# ----------------------------------------------------------------------------
# The module
# ----------------------------------------------------------------------------
class DrumTranscriptionModel:
    """JAX/Pallas port of the PyTorch base class. No learnable parameters."""

    def __init__(self, config):
        self.config = dict(config)

    def forward(self, x, conditioning=None):
        # TODO(synk): forward is abstract in the PyTorch base class — subclasses
        # define the actual network.
        raise NotImplementedError("Subclasses must implement forward method")

    # TODO(synk): configure_optimizers (Adam + ReduceLROnPlateau) is optimizer
    # state management, not a kernel; no Pallas equivalent.

    def compute_loss(self, predictions, targets, tile_rows=_MAX_TILE_ROWS):
        pos_weight = float(self.config.get("onset_positive_weight", 5.0))
        onset_w = float(self.config.get("onset_loss_weight", 1.0))
        vel_w = float(self.config.get("velocity_loss_weight", 0.5))

        r = _run_fused(predictions["onset_logits"], targets["onsets"],
                       predictions["velocities"], targets["velocities"],
                       pos_weight, do_bce=True, do_vel=True, tile_rows=tile_rows)

        onset_l = r["bce_sum"] / r["n_elems"]
        vel_l = jnp.where(r["vcnt"] > 0,
                          r["vsq_sum"] / jnp.maximum(r["vcnt"], 1.0), 0.0)
        total = onset_w * onset_l + vel_w * vel_l
        return {"onset_loss": onset_l, "velocity_loss": vel_l, "total_loss": total}


# ----------------------------------------------------------------------------
# Pure-JAX reference (same math, no Pallas) for a sanity check
# ----------------------------------------------------------------------------
def _reference(predictions, targets, pos_weight, onset_w, vel_w):
    x = predictions["onset_logits"].astype(jnp.float32)
    t = targets["onsets"].astype(jnp.float32)
    sp_neg = jnp.maximum(-x, 0.0) + jnp.log1p(jnp.exp(-jnp.abs(x)))
    sp_pos = sp_neg + x
    bce = jnp.mean(pos_weight * t * sp_neg + (1.0 - t) * sp_pos)
    mask = t > 0.5
    diff = predictions["velocities"].astype(jnp.float32) - targets["velocities"].astype(jnp.float32)
    cnt = jnp.sum(mask.astype(jnp.float32))
    vel = jnp.where(cnt > 0,
                    jnp.sum(jnp.where(mask, diff * diff, 0.0)) / jnp.maximum(cnt, 1.0),
                    0.0)
    return bce, vel, onset_w * bce + vel_w * vel


if __name__ == "__main__":
    config = {"onset_positive_weight": 5.0,
              "onset_loss_weight": 1.0,
              "velocity_loss_weight": 0.5}
    model = DrumTranscriptionModel(config)

    # ---- small test (exercises the padded, single-block path) ----
    B, T, D = 2, 16, 8   # batch, time frames, drum classes
    key = jax.random.PRNGKey(0)
    k1, k2, k3, k4 = jax.random.split(key, 4)
    onset_logits = jax.random.normal(k1, (B, T, D), dtype=jnp.float32)
    onsets = (jax.random.uniform(k2, (B, T, D)) > 0.7).astype(jnp.float32)
    velocities_pred = jax.random.uniform(k3, (B, T, D), dtype=jnp.float32)
    velocities_tgt = jax.random.uniform(k4, (B, T, D), dtype=jnp.float32)

    predictions = {"onset_logits": onset_logits, "velocities": velocities_pred}
    targets = {"onsets": onsets, "velocities": velocities_tgt}

    losses = model.compute_loss(predictions, targets)
    jax.block_until_ready(losses["total_loss"])

    ref_bce, ref_vel, ref_total = _reference(predictions, targets, 5.0, 1.0, 0.5)
    assert jnp.allclose(losses["onset_loss"], ref_bce, atol=1e-5, rtol=1e-5)
    assert jnp.allclose(losses["velocity_loss"], ref_vel, atol=1e-5, rtol=1e-5)
    assert jnp.allclose(losses["total_loss"], ref_total, atol=1e-5, rtol=1e-5)

    # standalone (specialized) helper kernels
    ol = onset_loss(onset_logits, onsets, pos_weight=5.0)
    vl = velocity_loss(velocities_pred, velocities_tgt, onsets > 0.5)
    jax.block_until_ready((ol, vl))
    assert jnp.allclose(ol, ref_bce, atol=1e-5, rtol=1e-5)
    assert jnp.allclose(vl, ref_vel, atol=1e-5, rtol=1e-5)

    # ---- medium test: multi-block grid (parallel=2, inner=2) with small tiles,
    # kept light-weight so the script runs fast on any TPU generation ----
    B2, T2, D2 = 2, 4096, 8   # 65,536 elements -> 128 rows of 512 lanes
    j1, j2, j3, j4 = jax.random.split(jax.random.PRNGKey(1), 4)
    med_logits = jax.random.normal(j1, (B2, T2, D2), dtype=jnp.float32)
    med_onsets = (jax.random.uniform(j2, (B2, T2, D2)) > 0.9).astype(jnp.float32)
    med_vpred = jax.random.uniform(j3, (B2, T2, D2), dtype=jnp.float32)
    med_vtgt = jax.random.uniform(j4, (B2, T2, D2), dtype=jnp.float32)

    med_pred = {"onset_logits": med_logits, "velocities": med_vpred}
    med_tgt = {"onsets": med_onsets, "velocities": med_vtgt}
    # tile_rows=32 forces 4 row-blocks -> grid (2 parallel, 2 arbitrary),
    # exercising both the cross-core partials and the in-VMEM accumulation.
    med_losses = model.compute_loss(med_pred, med_tgt, tile_rows=32)
    jax.block_until_ready(med_losses["total_loss"])

    rb, rv, rt = _reference(med_pred, med_tgt, 5.0, 1.0, 0.5)
    assert jnp.allclose(med_losses["onset_loss"], rb, atol=1e-5, rtol=1e-4)
    assert jnp.allclose(med_losses["velocity_loss"], rv, atol=1e-5, rtol=1e-4)
    assert jnp.allclose(med_losses["total_loss"], rt, atol=1e-5, rtol=1e-4)

    print("KERNEL_OK")
</pallas_src>

<mosaic_0001>
module attributes {stable_mosaic.version = 11 : i64} {
  func.func @kernel(%arg0: i32, %arg1: i32, %arg2: memref<8x512xf32, #tpu.memory_space<vmem>>, %arg3: memref<8x512xf32, #tpu.memory_space<vmem>>, %arg4: memref<8x512xf32, #tpu.memory_space<vmem>>, %arg5: memref<8x512xf32, #tpu.memory_space<vmem>>, %arg6: memref<1x3x512xf32, #tpu.memory_space<vmem>>, %arg7: memref<8x512xf32, #tpu.memory_space<vmem>>, %arg8: memref<8x512xf32, #tpu.memory_space<vmem>>, %arg9: memref<8x512xf32, #tpu.memory_space<vmem>>) attributes {dimension_semantics = [#tpu.dimension_semantics<parallel>, #tpu.dimension_semantics<arbitrary>], iteration_bounds = array<i64: 1, 1>, scalar_prefetch = 0 : i64, scratch_operands = 3 : i64, tpu.core_type = #tpu.core_type<tc>, window_params = [{transform_indices = @transform_0, window_bounds = array<i64: 8, 512>}, {transform_indices = @transform_1, window_bounds = array<i64: 8, 512>}, {transform_indices = @transform_2, window_bounds = array<i64: 8, 512>}, {transform_indices = @transform_3, window_bounds = array<i64: 8, 512>}, {transform_indices = @transform_4, window_bounds = array<i64: 1, 3, 512>}]} {
    %c0_i32 = arith.constant 0 : i32
    %0 = arith.cmpi eq, %arg1, %c0_i32 : i32
    %1 = arith.extui %0 : i1 to i32
    %c0_i32_0 = arith.constant 0 : i32
    %2 = arith.cmpi ne, %1, %c0_i32_0 : i32
    scf.if %2 {
      %cst_34 = arith.constant 0.000000e+00 : f32
      %53 = vector.broadcast %cst_34 : f32 to vector<8x512xf32>
      %c0_35 = arith.constant 0 : index
      %c0_36 = arith.constant 0 : index
      %54 = vector.load %arg7[%c0_35, %c0_36] : memref<8x512xf32, #tpu.memory_space<vmem>>, vector<8x512xf32>
      tpu.vector_store %arg7[%c0_35, %c0_36], %53 {strides = array<i32>} : memref<8x512xf32, #tpu.memory_space<vmem>>, vector<8x512xf32>,
      %cst_37 = arith.constant 0.000000e+00 : f32
      %55 = vector.broadcast %cst_37 : f32 to vector<8x512xf32>
      %c0_38 = arith.constant 0 : index
      %c0_39 = arith.constant 0 : index
      %56 = vector.load %arg8[%c0_38, %c0_39] : memref<8x512xf32, #tpu.memory_space<vmem>>, vector<8x512xf32>
      tpu.vector_store %arg8[%c0_38, %c0_39], %55 {strides = array<i32>} : memref<8x512xf32, #tpu.memory_space<vmem>>, vector<8x512xf32>,
      %cst_40 = arith.constant 0.000000e+00 : f32
      %57 = vector.broadcast %cst_40 : f32 to vector<8x512xf32>
      %c0_41 = arith.constant 0 : index
      %c0_42 = arith.constant 0 : index
      %58 = vector.load %arg9[%c0_41, %c0_42] : memref<8x512xf32, #tpu.memory_space<vmem>>, vector<8x512xf32>
      tpu.vector_store %arg9[%c0_41, %c0_42], %57 {strides = array<i32>} : memref<8x512xf32, #tpu.memory_space<vmem>>, vector<8x512xf32>,
    } else {
    }
    %c0 = arith.constant 0 : index
    %c0_1 = arith.constant 0 : index
    %3 = vector.load %arg3[%c0, %c0_1] : memref<8x512xf32, #tpu.memory_space<vmem>>, vector<8x512xf32>
    %c0_2 = arith.constant 0 : index
    %c0_3 = arith.constant 0 : index
    %4 = vector.load %arg2[%c0_2, %c0_3] : memref<8x512xf32, #tpu.memory_space<vmem>>, vector<8x512xf32>
    %cst = arith.constant 0.000000e+00 : f32
    %5 = vector.broadcast %cst : f32 to vector<8x512xf32>
    %6 = arith.subf %5, %4 : vector<8x512xf32>
    %cst_4 = arith.constant 0.000000e+00 : f32
    %7 = vector.broadcast %cst_4 : f32 to vector<8x512xf32>
    %8 = arith.maximumf %6, %7 : vector<8x512xf32>
    %9 = math.absf %4 : vector<8x512xf32>
    %cst_5 = arith.constant 0.000000e+00 : f32
    %10 = vector.broadcast %cst_5 : f32 to vector<8x512xf32>
    %11 = arith.subf %10, %9 : vector<8x512xf32>
    %12 = math.exp %11 : vector<8x512xf32>
    %13 = math.log1p %12 : vector<8x512xf32>
    %14 = arith.addf %8, %13 : vector<8x512xf32>
    %cst_6 = arith.constant 4.000000e+00 : f32
    %15 = vector.broadcast %cst_6 : f32 to vector<8x512xf32>
    %16 = arith.mulf %15, %3 : vector<8x512xf32>
    %cst_7 = arith.constant 1.000000e+00 : f32
    %17 = vector.broadcast %cst_7 : f32 to vector<8x512xf32>
    %18 = arith.addf %17, %16 : vector<8x512xf32>
    %19 = arith.mulf %14, %18 : vector<8x512xf32>
    %cst_8 = arith.constant 1.000000e+00 : f32
    %20 = vector.broadcast %cst_8 : f32 to vector<8x512xf32>
    %21 = arith.subf %20, %3 : vector<8x512xf32>
    %22 = arith.mulf %21, %4 : vector<8x512xf32>
    %23 = arith.addf %19, %22 : vector<8x512xf32>
    %cst_9 = arith.constant 5.000000e-01 : f32
    %24 = vector.broadcast %cst_9 : f32 to vector<8x512xf32>
    %25 = arith.cmpf ogt, %3, %24 : vector<8x512xf32>
    %c0_10 = arith.constant 0 : index
    %c0_11 = arith.constant 0 : index
    %26 = vector.load %arg4[%c0_10, %c0_11] : memref<8x512xf32, #tpu.memory_space<vmem>>, vector<8x512xf32>
    %c0_12 = arith.constant 0 : index
    %c0_13 = arith.constant 0 : index
    %27 = vector.load %arg5[%c0_12, %c0_13] : memref<8x512xf32, #tpu.memory_space<vmem>>, vector<8x512xf32>
    %28 = arith.subf %26, %27 : vector<8x512xf32>
    %29 = arith.mulf %28, %28 : vector<8x512xf32>
    %cst_14 = arith.constant 0.000000e+00 : f32
    %30 = vector.broadcast %cst_14 : f32 to vector<8x512xf32>
    %31 = arith.select %25, %29, %30 : vector<8x512xi1>, vector<8x512xf32>
    %cst_15 = arith.constant 1.000000e+00 : f32
    %cst_16 = arith.constant 0.000000e+00 : f32
    %32 = vector.broadcast %cst_15 : f32 to vector<8x512xf32>
    %33 = vector.broadcast %cst_16 : f32 to vector<8x512xf32>
    %34 = arith.select %25, %32, %33 : vector<8x512xi1>, vector<8x512xf32>
    %c0_17 = arith.constant 0 : index
    %c0_18 = arith.constant 0 : index
    %35 = vector.load %arg7[%c0_17, %c0_18] : memref<8x512xf32, #tpu.memory_space<vmem>>, vector<8x512xf32>
    %36 = vector.shape_cast %23 : vector<8x512xf32> to vector<1x8x512xf32>
    %cst_19 = arith.constant dense<0.000000e+00> : vector<8x512xf32>
    %37 = vector.multi_reduction <add>, %36, %cst_19 [0] : vector<1x8x512xf32> to vector<8x512xf32>
    %38 = arith.addf %35, %37 : vector<8x512xf32>
    %c0_20 = arith.constant 0 : index
    %c0_21 = arith.constant 0 : index
    %39 = vector.load %arg7[%c0_20, %c0_21] : memref<8x512xf32, #tpu.memory_space<vmem>>, vector<8x512xf32>
    tpu.vector_store %arg7[%c0_20, %c0_21], %38 {strides = array<i32>} : memref<8x512xf32, #tpu.memory_space<vmem>>, vector<8x512xf32>,
    %c0_22 = arith.constant 0 : index
    %c0_23 = arith.constant 0 : index
    %40 = vector.load %arg8[%c0_22, %c0_23] : memref<8x512xf32, #tpu.memory_space<vmem>>, vector<8x512xf32>
    %41 = vector.shape_cast %31 : vector<8x512xf32> to vector<1x8x512xf32>
    %cst_24 = arith.constant dense<0.000000e+00> : vector<8x512xf32>
    %42 = vector.multi_reduction <add>, %41, %cst_24 [0] : vector<1x8x512xf32> to vector<8x512xf32>
    %43 = arith.addf %40, %42 : vector<8x512xf32>
    %c0_25 = arith.constant 0 : index
    %c0_26 = arith.constant 0 : index
    %44 = vector.load %arg8[%c0_25, %c0_26] : memref<8x512xf32, #tpu.memory_space<vmem>>, vector<8x512xf32>
    tpu.vector_store %arg8[%c0_25, %c0_26], %43 {strides = array<i32>} : memref<8x512xf32, #tpu.memory_space<vmem>>, vector<8x512xf32>,
    %c0_27 = arith.constant 0 : index
    %c0_28 = arith.constant 0 : index
    %45 = vector.load %arg9[%c0_27, %c0_28] : memref<8x512xf32, #tpu.memory_space<vmem>>, vector<8x512xf32>
    %46 = vector.shape_cast %34 : vector<8x512xf32> to vector<1x8x512xf32>
    %cst_29 = arith.constant dense<0.000000e+00> : vector<8x512xf32>
    %47 = vector.multi_reduction <add>, %46, %cst_29 [0] : vector<1x8x512xf32> to vector<8x512xf32>
    %48 = arith.addf %45, %47 : vector<8x512xf32>
    %c0_30 = arith.constant 0 : index
    %c0_31 = arith.constant 0 : index
    %49 = vector.load %arg9[%c0_30, %c0_31] : memref<8x512xf32, #tpu.memory_space<vmem>>, vector<8x512xf32>
    tpu.vector_store %arg9[%c0_30, %c0_31], %48 {strides = array<i32>} : memref<8x512xf32, #tpu.memory_space<vmem>>, vector<8x512xf32>,
    %c0_i32_32 = arith.constant 0 : i32
    %50 = arith.cmpi eq, %arg1, %c0_i32_32 : i32
    %51 = arith.extui %50 : i1 to i32
    %c0_i32_33 = arith.constant 0 : i32
    %52 = arith.cmpi ne, %51, %c0_i32_33 : i32
    scf.if %52 {
      %c0_34 = arith.constant 0 : index
      %c0_35 = arith.constant 0 : index
      %53 = vector.load %arg7[%c0_34, %c0_35] : memref<8x512xf32, #tpu.memory_space<vmem>>, vector<8x512xf32>
      %cst_36 = arith.constant dense<0.000000e+00> : vector<512xf32>
      %54 = vector.multi_reduction <add>, %53, %cst_36 [0] : vector<8x512xf32> to vector<512xf32>
      %55 = vector.shape_cast %54 : vector<512xf32> to vector<1x512xf32>
      %c0_37 = arith.constant 0 : index
      %c0_38 = arith.constant 0 : index
      %56 = vector.load %arg8[%c0_37, %c0_38] : memref<8x512xf32, #tpu.memory_space<vmem>>, vector<8x512xf32>
      %cst_39 = arith.constant dense<0.000000e+00> : vector<512xf32>
      %57 = vector.multi_reduction <add>, %56, %cst_39 [0] : vector<8x512xf32> to vector<512xf32>
      %58 = vector.shape_cast %57 : vector<512xf32> to vector<1x512xf32>
      %c0_40 = arith.constant 0 : index
      %c0_41 = arith.constant 0 : index
      %59 = vector.load %arg9[%c0_40, %c0_41] : memref<8x512xf32, #tpu.memory_space<vmem>>, vector<8x512xf32>
      %cst_42 = arith.constant dense<0.000000e+00> : vector<512xf32>
      %60 = vector.multi_reduction <add>, %59, %cst_42 [0] : vector<8x512xf32> to vector<512xf32>
      %61 = vector.shape_cast %60 : vector<512xf32> to vector<1x512xf32>
      %62 = tpu.concatenate %55, %58, %61 in 0 : vector<1x512xf32>, vector<1x512xf32>, vector<1x512xf32> -> vector<3x512xf32>
      %c0_43 = arith.constant 0 : index
      %c0_44 = arith.constant 0 : index
      %c0_45 = arith.constant 0 : index
      %63 = vector.load %arg6[%c0_43, %c0_44, %c0_45] : memref<1x3x512xf32, #tpu.memory_space<vmem>>, vector<1x3x512xf32>
      %64 = vector.shape_cast %63 : vector<1x3x512xf32> to vector<3x512xf32>
      %65 = vector.shape_cast %62 : vector<3x512xf32> to vector<1x3x512xf32>
      tpu.vector_store %arg6[%c0_43, %c0_44, %c0_45], %65 {strides = array<i32>} : memref<1x3x512xf32, #tpu.memory_space<vmem>>, vector<1x3x512xf32>,
    } else {
    }
    return
  }
  func.func @transform_0(%arg0: i32, %arg1: i32) -> (i32, i32) {
    %c1_i32 = arith.constant 1 : i32
    %0 = arith.muli %arg0, %c1_i32 : i32
    %1 = arith.addi %0, %arg1 : i32
    %c0_i32 = arith.constant 0 : i32
    %c0_i32_0 = arith.constant 0 : i32
    return %1, %c0_i32 : i32, i32
  }
  func.func @transform_1(%arg0: i32, %arg1: i32) -> (i32, i32) {
    %c1_i32 = arith.constant 1 : i32
    %0 = arith.muli %arg0, %c1_i32 : i32
    %1 = arith.addi %0, %arg1 : i32
    %c0_i32 = arith.constant 0 : i32
    %c0_i32_0 = arith.constant 0 : i32
    return %1, %c0_i32 : i32, i32
  }
  func.func @transform_2(%arg0: i32, %arg1: i32) -> (i32, i32) {
    %c1_i32 = arith.constant 1 : i32
    %0 = arith.muli %arg0, %c1_i32 : i32
    %1 = arith.addi %0, %arg1 : i32
    %c0_i32 = arith.constant 0 : i32
    %c0_i32_0 = arith.constant 0 : i32
    return %1, %c0_i32 : i32, i32
  }
  func.func @transform_3(%arg0: i32, %arg1: i32) -> (i32, i32) {
    %c1_i32 = arith.constant 1 : i32
    %0 = arith.muli %arg0, %c1_i32 : i32
    %1 = arith.addi %0, %arg1 : i32
    %c0_i32 = arith.constant 0 : i32
    %c0_i32_0 = arith.constant 0 : i32
    return %1, %c0_i32 : i32, i32
  }
  func.func @transform_4(%arg0: i32, %arg1: i32) -> (i32, i32, i32) {
    %c0_i32 = arith.constant 0 : i32
    %c0_i32_0 = arith.constant 0 : i32
    %c0_i32_1 = arith.constant 0 : i32
    return %arg0, %c0_i32, %c0_i32_0 : i32, i32, i32
  }
}

</mosaic_0001>

<bundles_post_ra>
// kernel: tpu_custom_call.1
= control target key start
LH: loop header
LB: loop body
LE: loop exit
PB: predicated region body
PF: predicated region fallthrough
CT: control target
= control target key end

     0   :  { %9 = vsyncpa [#allocation6], 0  ;;  %s704_s0 = inlined_call_operand.hbm [shape: f32[8,512], index: 0, kind: input, shape index: {}]   ;;  %s705_s1 = inlined_call_operand.hbm [shape: f32[8,512], index: 1, kind: input, shape index: {}]   ;;  %s706_s2 = inlined_call_operand.hbm [shape: f32[8,512], index: 2, kind: input, shape index: {}]   ;;  %s707_s3 = inlined_call_operand.hbm [shape: f32[8,512], index: 3, kind: input, shape index: {}]   ;;  %s708_s4 = inlined_call_operand.vmem [shape: f32[1,3,512], index: 4, kind: output, shape index: {}]  }
   0x1   :  { %10 = vsyncpa [#allocation8], 0 }
   0x2   :  { %11 = vsyncpa [#allocation11], 0  ;;  %s501_s15 = smov [#allocation7]   ;;  %s502_s17 = smov [#allocation5]  }
   0x3   :  { %s36_s16 = sshll.u32 %s501_s15, 4  ;;  %s22_s18 = sshll.u32 %s502_s17, 4  ;;  %s37_s16 = int_to_ptr.vmem [resolvable:$true] %s36_s16  ;;  %s23_s18 = int_to_ptr.vmem [resolvable:$true] %s22_s18 }
   0x4   :  { %s407_s21 = scalar_lea.hbm %s705_s1, 512 }
   0x5   :  { %p408_p0 = scmp.ne.s32.totalorder %s705_s1, %s407_s21  ;;  %p411_p1 = scmp.lt.u32.totalorder %s407_s21, %s705_s1 }
   0x7   :  { %p413_p2 = pnand %p411_p1, %p408_p0 }
   0x9   :  { %416 = shalt.err (!%p413_p2)
}
   0xa   :  { %s417_s26 = scalar_lea.vmem %s37_s16, 512  ;;  %p422_p4 = scmp.lt.s32.totalorder %s37_s16, %s37_s16 }
   0xb   :  { %p418_p3 = scmp.ne.s32.totalorder %s37_s16, %s417_s26  ;;  %p423_p5 = scmp.lt.s32.totalorder %s417_s26, %s417_s26 }
   0xd   :  { %p424_p6 = por %p423_p5, %p422_p4 }
   0xf   :  { %p425_p7 = pnand %p424_p6, %p418_p3 }
  0x11   :  { %428 = shalt.err (!%p425_p7)
}
  0x12   :  { %39 = dma.hbm_to_vmem [thread:$0]  %s705_s1, 512, %s37_s16, [#allocation8]  }
  0x13   :  { %s429_s5 = scalar_lea.hbm %s704_s0, 512 }
  0x14   :  { %p430_p8 = scmp.ne.s32.totalorder %s704_s0, %s429_s5  ;;  %p433_p9 = scmp.lt.u32.totalorder %s429_s5, %s704_s0 }
  0x16   :  { %p435_p10 = pnand %p433_p9, %p430_p8 }
  0x18   :  { %438 = shalt.err (!%p435_p10)
}
  0x19   :  { %s439_s10 = scalar_lea.vmem %s23_s18, 512  ;;  %p444_p12 = scmp.lt.s32.totalorder %s23_s18, %s23_s18 }
  0x1a   :  { %p440_p11 = scmp.ne.s32.totalorder %s23_s18, %s439_s10  ;;  %p445_p13 = scmp.lt.s32.totalorder %s439_s10, %s439_s10 }
  0x1c   :  { %p446_p0 = por %p445_p13, %p444_p12 }
  0x1e   :  { %p447_p1 = pnand %p446_p0, %p440_p11 }
  0x20   :  { %450 = shalt.err (!%p447_p1)
}
  0x21   :  { %25 = dma.hbm_to_vmem [thread:$0]  %s704_s0, 512, %s23_s18, [#allocation6]  }
  0x22   :  { %s503_s12 = smov [#allocation9]   ;;  %s504_s14 = smov [#allocation10]  }
  0x23   :  { %s50_s13 = sshll.u32 %s503_s12, 4  ;;  %s64_s15 = sshll.u32 %s504_s14, 4  ;;  %s51_s13 = int_to_ptr.vmem [resolvable:$true] %s50_s13  ;;  %s65_s15 = int_to_ptr.vmem [resolvable:$true] %s64_s15 }
  0x24   :  { %s451_s19 = scalar_lea.hbm %s706_s2, 512 }
  0x25   :  { %p452_p2 = scmp.ne.s32.totalorder %s706_s2, %s451_s19  ;;  %p455_p3 = scmp.lt.u32.totalorder %s451_s19, %s706_s2 }
  0x27   :  { %p457_p4 = pnand %p455_p3, %p452_p2 }
  0x29   :  { %460 = shalt.err (!%p457_p4)
}
  0x2a   :  { %s461_s0 = scalar_lea.vmem %s51_s13, 512  ;;  %p466_p6 = scmp.lt.s32.totalorder %s51_s13, %s51_s13 }
  0x2b   :  { %p462_p5 = scmp.ne.s32.totalorder %s51_s13, %s461_s0  ;;  %p467_p7 = scmp.lt.s32.totalorder %s461_s0, %s461_s0 }
  0x2d   :  { %p468_p8 = por %p467_p7, %p466_p6 }
  0x2f   :  { %p469_p9 = pnand %p468_p8, %p462_p5 }
  0x31   :  { %472 = shalt.err (!%p469_p9)
}
  0x32   :  { %53 = dma.hbm_to_vmem [thread:$0]  %s706_s2, 512, %s51_s13, [#allocation8]  }
  0x33   :  { %s473_s27 = scalar_lea.hbm %s707_s3, 512 }
  0x34   :  { %p474_p10 = scmp.ne.s32.totalorder %s707_s3, %s473_s27  ;;  %p477_p11 = scmp.lt.u32.totalorder %s473_s27, %s707_s3 }
  0x36   :  { %p479_p12 = pnand %p477_p11, %p474_p10 }
  0x38   :  { %482 = shalt.err (!%p479_p12)
}
  0x39   :  { %s483_s6 = scalar_lea.vmem %s65_s15, 512  ;;  %p488_p0 = scmp.lt.s32.totalorder %s65_s15, %s65_s15 }
  0x3a   :  { %p484_p13 = scmp.ne.s32.totalorder %s65_s15, %s483_s6  ;;  %p489_p1 = scmp.lt.s32.totalorder %s483_s6, %s483_s6 }
  0x3c   :  { %p490_p2 = por %p489_p1, %p488_p0 }
  0x3e   :  { %p491_p3 = pnand %p490_p2, %p484_p13 }
  0x40   :  { %494 = shalt.err (!%p491_p3)
}
  0x41   :  { %67 = dma.hbm_to_vmem [thread:$0]  %s707_s3, 512, %s65_s15, [#allocation11]  }
  0x42   :  { %495 = dma.done.wait [#allocation6], 512  }
  0x43   :  { %496 = vsyncadd [#allocation6], 4294966784 }
  0x44   :  { %497 = dma.done.wait [#allocation8], 1024  }
  0x45   :  { %498 = vsyncadd [#allocation8], 4294966272 }
  0x46   :  { %499 = dma.done.wait [#allocation11], 512  }
  0x47   :  { %500 = vsyncadd [#allocation11], 4294966784  ;;  %v104_v0 = vld [vmem:[#allocation5] sm:$0xff]  ;;  %v579_v1 = vld [vmem:[#allocation5 + $0x8] sm:$0xff]  ;;  %vm359_vm8 = vcmask 1040384   ;;  %vm364_vm9 = vcmask 1041408  }
  0x48   :  { %v581_v2 = vld [vmem:[#allocation5 + $0x10] sm:$0xff]  ;;  %v583_v3 = vld [vmem:[#allocation5 + $0x18] sm:$0xff]  ;;  %v116_v4 = vand.u32 2147483647, %v104_v0  ;;  %v117_v5 = vand.u32 2147483647, %v579_v1 }
  0x49   :  { %v118_v6 = vand.u32 2147483647, %v581_v2  ;;  %v119_v7 = vand.u32 2147483647, %v583_v3  ;;  %v588_v16 = vld [vmem:[#allocation7] sm:$0xff]  ;;  %v590_v17 = vld [vmem:[#allocation7 + $0x8] sm:$0xff] }
  0x4a   :  { %v120_v8 = vsub.f32 0.0, %v116_v4  ;;  %v121_v9 = vsub.f32 0.0, %v117_v5  ;;  %v592_v18 = vld [vmem:[#allocation7 + $0x10] sm:$0xff]  ;;  %v594_v19 = vld [vmem:[#allocation7 + $0x18] sm:$0xff]  ;;  %v108_v20 = vsub.f32 0.0, %v104_v0  ;;  %v109_v21 = vsub.f32 0.0, %v579_v1 }
  0x4b   :  { %v122_v10 = vsub.f32 0.0, %v118_v6  ;;  %v123_v11 = vsub.f32 0.0, %v119_v7  ;;  %v110_v22 = vsub.f32 0.0, %v581_v2  ;;  %v200_v23 = vld [vmem:[#allocation9] sm:$0xff]  ;;  %v111_v25 = vsub.f32 0.0, %v583_v3  ;;  %v201_v30 = vld [vmem:[#allocation9 + $0x8] sm:$0xff] }
  0x4c   :  { %v124_v12 = vmul.f32 1.442695, %v120_v8  ;;  %v126_v13 = vmul.f32 1.442695, %v121_v9  ;;  %v204_v24 = vld [vmem:[#allocation10] sm:$0xff]  ;;  %v172_v26 = vmul.f32 4.0, %v588_v16 }
  0x4d   :  { %v128_v14 = vmul.f32 1.442695, %v122_v10  ;;  %v130_v15 = vmul.f32 1.442695, %v123_v11  ;;  %v173_v27 = vmul.f32 4.0, %v590_v17  ;;  %v174_v28 = vmul.f32 4.0, %v592_v18 }
  0x4e   :  { %391 = vpow2.f32 %v124_v12  ;;  %v175_v29 = vmul.f32 4.0, %v594_v19  ;;  %v205_v31 = vld [vmem:[#allocation10 + $0x8] sm:$0xff]  ;;  %v184_v32 = vsub.f32 1.0, %v588_v16  ;;  %v208_v33 = vsub.f32 %v200_v23, %v204_v24  ;;  %v202_v37 = vld [vmem:[#allocation9 + $0x10] sm:$0xff]  ;;  %v203_v42 = vld [vmem:[#allocation9 + $0x18] sm:$0xff] }
  0x4f   :  { %393 = vpow2.f32 %v126_v13  ;;  %v604_v34 = vmax.f32 %v108_v20, 0.0  ;;  %v606_v35 = vmax.f32 %v109_v21, 0.0  ;;  %v608_v36 = vmax.f32 %v110_v22, 0.0  ;;  %v206_v38 = vld [vmem:[#allocation10 + $0x10] sm:$0xff]  ;;  %v207_v43 = vld [vmem:[#allocation10 + $0x18] sm:$0xff] }
  0x50   :  { %395 = vpow2.f32 %v128_v14  ;;  %v610_v39 = vmax.f32 %v111_v25, 0.0  ;;  %v185_v40 = vsub.f32 1.0, %v590_v17  ;;  %v186_v41 = vsub.f32 1.0, %v592_v18 }
  0x51   :  { %397 = vpow2.f32 %v130_v15  ;;  %v209_v44 = vsub.f32 %v201_v30, %v205_v31  ;;  %v614_v45 = vadd.f32 1.0, %v172_v26  ;;  %v616_v46 = vadd.f32 1.0, %v173_v27 }
  0x52   :  { %v618_v47 = vadd.f32 1.0, %v174_v28  ;;  %v620_v48 = vadd.f32 1.0, %v175_v29  ;;  %v187_v50 = vsub.f32 1.0, %v594_v19  ;;  %v623_v51 = vmul.f32 %v184_v32, %v104_v0 }
  0x53   :  { %v210_v52 = vsub.f32 %v202_v37, %v206_v38  ;;  %v212_v53 = vmul.f32 %v208_v33, %v208_v33  ;;  %vm196_vm0 = vcmp.gt.f32.partialorder %v588_v16, 0.5  ;;  %vm197_vm1 = vcmp.gt.f32.partialorder %v590_v17, 0.5 }
  0x54   :  { %v211_v56 = vsub.f32 %v203_v42, %v207_v43  ;;  %v628_v59 = vmul.f32 %v185_v40, %v579_v1  ;;  %v631_v60 = vmul.f32 %v186_v41, %v581_v2  ;;  %v213_v61 = vmul.f32 %v209_v44, %v209_v44 }
  0x55   :  { %vm198_vm2 = vcmp.gt.f32.partialorder %v592_v18, 0.5  ;;  %vm199_vm3 = vcmp.gt.f32.partialorder %v594_v19, 0.5  ;;  %v214_v4 = vmul.f32 %v210_v52, %v210_v52  ;;  %v216_v5 = vsel %vm196_vm0, %v212_v53, 0.0 }
  0x56   :  { %v215_v6 = vmul.f32 %v211_v56, %v211_v56  ;;  %v641_v8 = vmul.f32 %v187_v50, %v583_v3  ;;  %v217_v9 = vsel %vm197_vm1, %v213_v61, 0.0  ;;  %v505_v10 = vmov 0.0  }
  0x57   :  { %v220_v11 = vsel %vm196_vm0, 1.0, %v505_v10  ;;  %v221_v12 = vsel %vm197_vm1, 1.0, %v505_v10  ;;  %v222_v13 = vsel %vm198_vm2, 1.0, %v505_v10  ;;  %v307_v14 = vrot.slane %v216_v5, 4 }
  0x58   :  { %v392_v49 = vpop.eup %391  ;;  %v218_v3 = vsel %vm198_vm2, %v214_v4, 0.0  ;;  %v223_v21 = vsel %vm199_vm3, 1.0, %v505_v10  ;;  %v219_v23 = vsel %vm199_vm3, %v215_v6, 0.0  ;;  %v313_v17 = vrot.slane %v217_v9, 4 }
  0x59   :  { %v394_v54 = vpop.eup %393  ;;  %v132_v55 = vadd.f32 1.0, %v392_v49  ;;  %v135_v0 = vmul.f32 -0.5, %v392_v49  ;;  %v138_v22 = vand.u32 2147483647, %v392_v49  ;;  %v335_v26 = vrot.slane %v220_v11, 4 }
  0x5a   :  { %v396_v57 = vpop.eup %395  ;;  %v141_v58 = vadd.f32 1.0, %v394_v54  ;;  %v144_v1 = vmul.f32 -0.5, %v394_v54  ;;  %v147_v24 = vand.u32 2147483647, %v394_v54  ;;  %v341_v27 = vrot.slane %v221_v12, 4 }
  0x5b   :  { %v633_v62 = vpop.eup %397  ;;  %399 = vlog2.f32 %v132_v55  ;;  %v150_v63 = vadd.f32 1.0, %v396_v57  ;;  %v153_v7 = vmul.f32 -0.5, %v396_v57  ;;  %v136_v15 = vadd.f32 1.0, %v135_v0 }
  0x5c   :  { %401 = vlog2.f32 %v141_v58  ;;  %v159_v2 = vadd.f32 1.0, %v633_v62  ;;  %v162_v20 = vmul.f32 -0.5, %v633_v62  ;;  %v145_v16 = vadd.f32 1.0, %v144_v1 }
  0x5d   :  { %403 = vlog2.f32 %v150_v63  ;;  %v154_v25 = vadd.f32 1.0, %v153_v7  ;;  %v156_v28 = vand.u32 2147483647, %v396_v57  ;;  %v308_v29 = vadd.f32 %v307_v14, %v216_v5 }
  0x5e   :  { %405 = vlog2.f32 %v159_v2  ;;  %v347_v30 = vrot.slane %v222_v13, 4  ;;  %v353_v31 = vrot.slane %v223_v21, 4  ;;  %v137_v32 = vmul.f32 %v392_v49, %v136_v15 }
  0x5f   :  { %v163_v18 = vadd.f32 1.0, %v162_v20  ;;  %v319_v33 = vrot.slane %v218_v3, 4  ;;  %v325_v37 = vrot.slane %v219_v23, 4  ;;  %vm658_vm4 = vcmp.lt.f32.partialorder %v138_v22, 0.0004427343 }
  0x60   :  { %v146_v19 = vmul.f32 %v394_v54, %v145_v16  ;;  %v165_v41 = vand.u32 2147483647, %v633_v62  ;;  %v314_v42 = vadd.f32 %v313_v17, %v217_v9  ;;  %vm663_vm5 = vcmp.lt.f32.partialorder %v147_v24, 0.0004427343 }
  0x61   :  { %v155_v52 = vmul.f32 %v396_v57, %v154_v25  ;;  %v336_v49 = vadd.f32 %v335_v26, %v220_v11  ;;  %vm667_vm6 = vcmp.lt.f32.partialorder %v156_v28, 0.0004427343  ;;  %v309_v58 = vrot.slane %v308_v29, 2 }
  0x62   :  { %v342_v61 = vadd.f32 %v341_v27, %v221_v12  ;;  %v164_v0 = vmul.f32 %v633_v62, %v163_v18  ;;  %v320_v4 = vadd.f32 %v319_v33, %v218_v3  ;;  %vm166_vm7 = vcmp.lt.f32.partialorder %v165_v41, 0.0004427343 }
  0x63   :  { %v315_v2 = vrot.slane %v314_v42, 2  ;;  %v348_v10 = vadd.f32 %v347_v30, %v222_v13  ;;  %v326_v12 = vadd.f32 %v325_v37, %v219_v23  ;;  %v337_v14 = vrot.slane %v336_v49, 2 }
  0x64   :  { %v321_v3 = vrot.slane %v320_v4, 2  ;;  %v354_v22 = vadd.f32 %v353_v31, %v223_v21  ;;  %v343_v24 = vrot.slane %v342_v61, 2  ;;  %v310_v13 = vadd.f32 %v309_v58, %v308_v29 }
  0x65   :  { %v400_v38 = vpop.eup %399  ;;  %v349_v25 = vrot.slane %v348_v10, 2  ;;  %v338_v28 = vadd.f32 %v337_v14, %v336_v49 }
  0x66   :  { %v402_v43 = vpop.eup %401  ;;  %v134_v44 = vmul.f32 0.6931472, %v400_v38  ;;  %v322_v21 = vadd.f32 %v321_v3, %v320_v4  ;;  %v344_v31 = vadd.f32 %v343_v24, %v342_v61  ;;  %v311_v29 = vrot.slane %v310_v13, 1 }
  0x67   :  { %v404_v53 = vpop.eup %403  ;;  %v143_v55 = vmul.f32 0.6931472, %v402_v43  ;;  %v350_v18 = vadd.f32 %v349_v25, %v348_v10 }
  0x68   :  { %v140_v54 = vsel %vm658_vm4, %v137_v32, %v134_v44  ;;  %v152_v63 = vmul.f32 0.6931472, %v404_v53  ;;  %v406_v5 = vpop.eup %405  ;;  %v323_v40 = vrot.slane %v322_v21, 1 }
  0x69   :  { %v149_v57 = vsel %vm663_vm5, %v146_v19, %v143_v55  ;;  %v168_v1 = vadd.f32 %v140_v54, %v604_v34  ;;  %v161_v7 = vmul.f32 0.6931472, %v406_v5  ;;  %v339_v19 = vrot.slane %v338_v28, 1 }
  0x6a   :  { %v158_v6 = vsel %vm667_vm6, %v155_v52, %v152_v63  ;;  %v169_v9 = vadd.f32 %v149_v57, %v606_v35  ;;  %v312_v52 = vadd.f32 %v311_v29, %v310_v13  ;;  %v351_v53 = vrot.slane %v350_v18, 1 }
  0x6b   :  { %v170_v11 = vadd.f32 %v158_v6, %v608_v36  ;;  %v180_v62 = vmul.f32 %v614_v45, %v168_v1  ;;  %v167_v15 = vsel %vm166_vm7, %v164_v0, %v161_v7  ;;  %v316_v36 = vadd.f32 %v315_v2, %v314_v42 }
  0x6c   :  { %v181_v20 = vmul.f32 %v616_v46, %v169_v9  ;;  %v171_v34 = vadd.f32 %v167_v15, %v610_v39  ;;  %v327_v46 = vrot.slane %v326_v12, 2  ;;  %v355_v39 = vrot.slane %v354_v22, 2 }
  0x6d   :  { %v182_v16 = vmul.f32 %v618_v47, %v170_v11  ;;  %v192_v17 = vadd.f32 %v623_v51, %v180_v62  ;;  %v317_v32 = vrot.slane %v316_v36, 1  ;;  %v324_v63 = vadd.f32 %v323_v40, %v322_v21 }
  0x6e   :  { %v193_v35 = vadd.f32 %v628_v59, %v181_v20  ;;  %v183_v45 = vmul.f32 %v620_v48, %v171_v34  ;;  %v328_v37 = vadd.f32 %v327_v46, %v326_v12  ;;  %v356_v41 = vadd.f32 %v355_v39, %v354_v22 }
  0x6f   :  { %v194_v23 = vadd.f32 %v631_v60, %v182_v16  ;;  %v279_v26 = vrot.slane %v192_v17, 4  ;;  %v318_v49 = vadd.f32 %v317_v32, %v316_v36  ;;  %v340_v0 = vadd.f32 %v339_v19, %v338_v28 }
  0x70   :  { %v285_v27 = vrot.slane %v193_v35, 4  ;;  %v195_v47 = vadd.f32 %v641_v8, %v183_v45  ;;  %v345_v8 = vrot.slane %v344_v31, 1  ;;  %v329_v61 = vrot.slane %v328_v37, 1 }
  0x71   :  { %v280_v51 = vadd.f32 %v279_v26, %v192_v17  ;;  %v291_v30 = vrot.slane %v194_v23, 4  ;;  %v357_v4 = vrot.slane %v356_v41, 1  ;;  %v352_v7 = vadd.f32 %v351_v53, %v350_v18 }
  0x72   :  { %v286_v59 = vadd.f32 %v285_v27, %v193_v35  ;;  %v297_v60 = vrot.slane %v195_v47, 4  ;;  %v346_v2 = vadd.f32 %v345_v8, %v344_v31  ;;  %v330_v11 = vadd.f32 %v329_v61, %v328_v37 }
  0x73   :  { %v281_v48 = vrot.slane %v280_v51, 2  ;;  %v292_v33 = vadd.f32 %v291_v30, %v194_v23  ;;  %v358_v12 = vadd.f32 %v357_v4, %v356_v41 }
  0x74   :  { %v287_v38 = vrot.slane %v286_v59, 2  ;;  %v298_v44 = vadd.f32 %v297_v60, %v195_v47 }
  0x75   :  { %v282_v42 = vadd.f32 %v281_v48, %v280_v51  ;;  %v293_v43 = vrot.slane %v292_v33, 2 }
  0x76   :  { %v288_v50 = vadd.f32 %v287_v38, %v286_v59  ;;  %v299_v58 = vrot.slane %v298_v44, 2 }
  0x77   :  { %v283_v55 = vrot.slane %v282_v42, 1  ;;  %v294_v56 = vadd.f32 %v293_v43, %v292_v33 }
  0x78   :  { %v289_v54 = vrot.slane %v288_v50, 1  ;;  %v300_v1 = vadd.f32 %v299_v58, %v298_v44 }
  0x79   :  { %v284_v5 = vadd.f32 %v283_v55, %v282_v42  ;;  %v295_v57 = vrot.slane %v294_v56, 1 }
  0x7a   :  { %v290_v6 = vadd.f32 %v289_v54, %v288_v50  ;;  %v301_v10 = vrot.slane %v300_v1, 1 }
  0x7b   :  { %v296_v9 = vadd.f32 %v295_v57, %v294_v56  ;;  %v360_v62 = vsel %vm359_vm8, %v284_v5, %v312_v52 }
  0x7c   :  { %v361_v14 = vsel %vm359_vm8, %v290_v6, %v318_v49  ;;  %v365_v15 = vsel %vm364_vm9, %v360_v62, %v340_v0  ;;  %v302_v20 = vadd.f32 %v301_v10, %v300_v1 }
  0x7d   :  { %v362_v3 = vsel %vm359_vm8, %v296_v9, %v324_v63  ;;  %v366_v22 = vsel %vm364_vm9, %v361_v14, %v346_v2 }
  0x7e   :  { %v367_v34 = vsel %vm364_vm9, %v362_v3, %v352_v7  ;;  %v373_v16 = vcombine.low %v365_v15, %v366_v22  ;;  %v363_v17 = vsel %vm359_vm8, %v302_v20, %v330_v11 }
  0x7f   :  { %v368_v24 = vsel %vm364_vm9, %v363_v17, %v358_v12 }
  0x80   :  { %377 = vst [vmem:[%s708_s4] sm:$0x77] %v373_v16  ;;  %v374_v35 = vcombine.low %v367_v34, %v368_v24 }
  0x82   :  { %378 = vst [vmem:[%s708_s4 + $0x8] sm:$0x77] %v374_v35 }
  0x83   :  { %383 = vsyncpa [#allocation6], 1 }
  0x84   :  { %384 = vsyncpa [#allocation8], 1 }
  0x85   :  { %385 = vsyncpa [#allocation11], 1 }

</bundles_post_ra>
